<compile_context>
chip_gen: v7x
topology: tpu7x:2x2x1
jax: 0.10.0
libtpu: 0.0.40
codegen_flags: <defaults>
</compile_context>

<pallas_src>
import jax
import jax.numpy as jnp
from jax.experimental import pallas as pl
from jax.experimental.pallas import tpu as pltpu


_INV_SQRT2 = 0.7071067811865476


def _round_up(x, m):
    return ((x + m - 1) // m) * m


def _sublane(dtype):
    """Rows per vreg sublane group for this dtype (8 f32, 16 bf16, 32 int8/fp8)."""
    itemsize = jnp.dtype(dtype).itemsize
    if itemsize >= 4:
        return 8
    if itemsize == 2:
        return 16
    return 32


def _vmem_capacity_bytes():
    """Physical per-core VMEM (128 MiB v5e/v6e, 64 MiB v7x); conservative fallback."""
    try:
        info = pltpu.get_tpu_info()
        cap = int(getattr(info, "vmem_capacity_bytes", 0) or 0)
        if cap > 0:
            return cap
    except Exception:
        pass
    return 64 * 1024 * 1024  # assume the smallest (v7x) part when unknown


def _vmem_limit(est_bytes, hw_vmem):
    """vmem_limit_bytes: footprint + 25% + 2 MiB headroom, capped at physical - 8 MiB.

    Never set below the real requirement (that only converts a tiling problem into a
    compile failure)."""
    want = max(int(est_bytes) * 5 // 4 + (2 << 20), 16 << 20)
    hard_cap = max(hw_vmem - (8 << 20), 32 << 20)
    return int(min(want, hard_cap))


def _bias_gelu(acc_f32, bias_row, out_dtype):
    """Bias add (f32) + exact erf-GELU (nn.GELU() default), cast to out_dtype.

    When the output is bf16, run the GELU polynomial in bf16: on v6e/v7x the VALU/EUP
    are bf16-capable, so the epilogue packs 2x per vreg and roughly halves the
    VALU-slot pressure that otherwise binds before the MXU. Dropout(p=0.0) = identity.
    """
    y = acc_f32 + bias_row.astype(jnp.float32)
    if jnp.dtype(out_dtype) == jnp.dtype(jnp.bfloat16):
        z = y.astype(jnp.bfloat16)
        return (jnp.bfloat16(0.5) * z) * (
            jnp.bfloat16(1.0) + jax.lax.erf(z * jnp.bfloat16(_INV_SQRT2))
        )
    g = 0.5 * y * (1.0 + jax.lax.erf(y * jnp.float32(_INV_SQRT2)))
    return g.astype(out_dtype)
    # TODO(synk): tanh-approx GELU would move the transcendental to the idle EUP slot,
    # but it changes numerics vs nn.GELU() default, so it is not enabled here.


def _mlp_kernel_resident(x_ref, w_ref, b_ref, o_ref):
    # Weight/bias blocks have constant index_maps -> fetched into VMEM once and kept
    # resident across every row tile (weight HBM traffic = |W|, not (M/tm) x |W|).
    acc = jnp.dot(x_ref[...], w_ref[...], preferred_element_type=jnp.float32)
    o_ref[...] = _bias_gelu(acc, b_ref[...], o_ref.dtype)


def _mlp_kernel_streamed(x_ref, w_ref, b_ref, o_ref, acc_ref):
    k = pl.program_id(2)

    @pl.when(k == 0)
    def _():
        acc_ref[...] = jnp.zeros_like(acc_ref)

    acc_ref[...] += jnp.dot(x_ref[...], w_ref[...], preferred_element_type=jnp.float32)

    @pl.when(k == pl.num_programs(2) - 1)
    def _():
        o_ref[...] = _bias_gelu(acc_ref[...], b_ref[...], o_ref.dtype)


def mlp_forward(x, w, b, *, tm=None, tn=None, tk=None,
                cast_inputs_to_bf16=False, force_streamed=False):
    """x: (B, N, C_in), w: (C_in, C_out), b: (C_out,) -> (B, N, C_out)."""
    out_dtype = x.dtype
    B, N, C_in = x.shape
    C_out = w.shape[1]
    M = B * N

    if cast_inputs_to_bf16 and jnp.dtype(x.dtype) == jnp.dtype(jnp.float32):
        # Optional: bf16 operands hit the MXU natively (f32 runs in multi-pass
        # emulation; v7x MXU is bf16/fp8-only). Accumulation stays f32. Off by default
        # to preserve exact f32 forward semantics of the PyTorch module.
        x = x.astype(jnp.bfloat16)
        w = w.astype(jnp.bfloat16)

    x2 = x.reshape(M, C_in)          # contiguous reshape: no HBM copy
    b2 = b.reshape(1, C_out)

    x_b = jnp.dtype(x.dtype).itemsize
    w_b = jnp.dtype(w.dtype).itemsize
    b_b = jnp.dtype(b.dtype).itemsize
    o_b = jnp.dtype(out_dtype).itemsize

    # ---- generation-aware VMEM budget & row tile cap -------------------------------
    hw_vmem = _vmem_capacity_bytes()
    budget = (hw_vmem * 3) // 4          # ~48 MiB on v7x (64 MiB), ~96 MiB on v5e/v6e
    big_vmem = hw_vmem >= 100 * 1024 * 1024
    sub = _sublane(x.dtype)

    tm_cap = tm if tm is not None else (512 if big_vmem else 256)
    tm_cap = max(sub, _round_up(tm_cap, sub))

    # ---- Path A: weight-resident (preferred whenever it fits the budget) -----------
    def resident_bytes(tm_):
        # conservatively charge 2 buffers per operand (Pallas default double-buffering),
        # even though the constant-index weight/bias are only DMA'd once.
        return (2 * C_in * C_out * w_b + 2 * C_out * b_b
                + 2 * tm_ * C_in * x_b + 2 * tm_ * C_out * o_b)

    use_resident = False
    tm_res = None
    if not force_streamed:
        cand = min(tm_cap, max(sub, _round_up(M, sub)))
        while cand >= sub:
            if resident_bytes(cand) <= budget:
                use_resident, tm_res = True, cand
                break
            nxt = _round_up(max(sub, cand // 2), sub)
            if nxt >= cand:
                break
            cand = nxt

    if use_resident:
        est = resident_bytes(tm_res)
        out = pl.pallas_call(
            _mlp_kernel_resident,
            out_shape=jax.ShapeDtypeStruct((M, C_out), out_dtype),
            grid_spec=pltpu.PrefetchScalarGridSpec(
                num_scalar_prefetch=0,
                grid=(pl.cdiv(M, tm_res),),           # ragged last row tile is masked
                in_specs=[
                    pl.BlockSpec((tm_res, C_in), lambda i: (i, 0)),     # token row tile
                    pl.BlockSpec((C_in, C_out), lambda i: (0, 0)),      # resident weight
                    pl.BlockSpec((1, C_out), lambda i: (0, 0)),         # resident bias
                ],
                out_specs=pl.BlockSpec((tm_res, C_out), lambda i: (i, 0)),
            ),
            compiler_params=pltpu.CompilerParams(
                # Row tiles are independent: on v7x the two TensorCores split them and
                # each keeps its own resident copy of W (budget is per-TC already).
                dimension_semantics=("parallel",),
                vmem_limit_bytes=_vmem_limit(est, hw_vmem),
            ),
        )(x2, w, b2)
        return out.reshape(B, N, C_out)

    # ---- Path B: streamed weight with (rows, out-cols, K) grid + f32 accumulator ----
    tn_cap = tn if tn is not None else (512 if big_vmem else 256)
    tn_eff = min(_round_up(tn_cap, 128), _round_up(C_out, 128))

    if tk is not None:
        tk_eff = tk
    else:
        tk_eff = C_in
        if C_in > 2048:
            for cand in (2048, 1024, 512, 256):
                if C_in % cand == 0:
                    tk_eff = cand
                    break
    # K tile must divide C_in exactly (ragged K would corrupt the accumulation) and be
    # lane-aligned (multiple of 128) unless it is the full C_in.
    if (C_in % tk_eff != 0) or (tk_eff != C_in and tk_eff % 128 != 0):
        tk_eff = C_in

    tm_eff = min(tm_cap, max(sub, _round_up(M, sub)))

    def streamed_bytes(tm_, tn_, tk_):
        return (2 * tm_ * tk_ * x_b        # x tile, double-buffered
                + 2 * tk_ * tn_ * w_b      # weight tile, double-buffered
                + 2 * tn_ * b_b            # bias tile
                + 2 * tm_ * tn_ * o_b      # output tile, double-buffered
                + tm_ * tn_ * 4)           # f32 accumulator scratch

    while streamed_bytes(tm_eff, tn_eff, tk_eff) > budget:
        if tk_eff >= 1024 and tk_eff % 256 == 0:
            tk_eff //= 2
        elif tm_eff > 128:
            tm_eff = _round_up(tm_eff // 2, sub)
        elif tn_eff > 128:
            tn_eff = _round_up(tn_eff // 2, 128)
        else:
            break

    grid = (pl.cdiv(M, tm_eff), pl.cdiv(C_out, tn_eff), C_in // tk_eff)
    est = streamed_bytes(tm_eff, tn_eff, tk_eff)

    # TODO(synk): when the weight stays streamed with very large C_in and VMEM allows
    # (v5e/v6e), add pipeline_mode=pl.Buffered(3) on the weight BlockSpec to hide DMA
    # jitter and the row-tile boundary refetch bubble.
    out = pl.pallas_call(
        _mlp_kernel_streamed,
        out_shape=jax.ShapeDtypeStruct((M, C_out), out_dtype),
        grid_spec=pltpu.PrefetchScalarGridSpec(
            num_scalar_prefetch=0,
            grid=grid,
            in_specs=[
                pl.BlockSpec((tm_eff, tk_eff), lambda i, j, k: (i, k)),
                pl.BlockSpec((tk_eff, tn_eff), lambda i, j, k: (k, j)),
                pl.BlockSpec((1, tn_eff), lambda i, j, k: (0, j)),
            ],
            out_specs=pl.BlockSpec((tm_eff, tn_eff), lambda i, j, k: (i, j)),
            scratch_shapes=[pltpu.VMEM((tm_eff, tn_eff), jnp.float32)],
        ),
        compiler_params=pltpu.CompilerParams(
            dimension_semantics=("parallel", "parallel", "arbitrary"),
            vmem_limit_bytes=_vmem_limit(est, hw_vmem),
        ),
    )(x2, w, b2)
    return out.reshape(B, N, C_out)


def mlp_reference(x, w, b):
    y = jnp.einsum("bnc,cd->bnd",
                   x.astype(jnp.float32), w.astype(jnp.float32)) + b.astype(jnp.float32)
    g = 0.5 * y * (1.0 + jax.lax.erf(y * jnp.float32(_INV_SQRT2)))
    return g.astype(x.dtype)


if __name__ == "__main__":
    key = jax.random.PRNGKey(0)

    # --- Case 1: small ViT-ish shapes (weight-resident fast path) ---
    B, N, C_in, C_out = 2, 8, 32, 64
    k1, k2, k3, key = jax.random.split(key, 4)
    x = jax.random.normal(k1, (B, N, C_in), dtype=jnp.float32)
    w = jax.random.normal(k2, (C_in, C_out), dtype=jnp.float32) * 0.02  # nn.Linear(in, out)
    b = jax.random.normal(k3, (C_out,), dtype=jnp.float32) * 0.02
    out = jax.block_until_ready(mlp_forward(x, w, b))
    ref = mlp_reference(x, w, b)
    assert out.shape == (B, N, C_out)
    assert jnp.allclose(out, ref, atol=1e-5, rtol=1e-5), "resident-path mismatch"

    # --- Case 2: force the streamed / K-tiled path (ragged row + column edges,
    #     f32 accumulator, epilogue under pl.when) at small shapes ---
    B2, N2, C_in2, C_out2 = 2, 10, 256, 320
    k1, k2, k3, key = jax.random.split(key, 4)
    x2 = jax.random.normal(k1, (B2, N2, C_in2), dtype=jnp.float32)
    w2 = jax.random.normal(k2, (C_in2, C_out2), dtype=jnp.float32) * 0.02
    b2 = jax.random.normal(k3, (C_out2,), dtype=jnp.float32) * 0.02
    out2 = jax.block_until_ready(
        mlp_forward(x2, w2, b2, tm=8, tn=128, tk=128, force_streamed=True))
    ref2 = mlp_reference(x2, w2, b2)
    assert out2.shape == (B2, N2, C_out2)
    assert jnp.allclose(out2, ref2, atol=1e-4, rtol=1e-4), "streamed-path mismatch"

    print("KERNEL_OK")
</pallas_src>

<mosaic_0001>
module attributes {stable_mosaic.version = 11 : i64} {
  func.func @_mlp_kernel_resident(%arg0: i32, %arg1: memref<16x32xf32, #tpu.memory_space<vmem>>, %arg2: memref<32x64xf32, #tpu.memory_space<vmem>>, %arg3: memref<1x64xf32, #tpu.memory_space<vmem>>, %arg4: memref<16x64xf32, #tpu.memory_space<vmem>>) attributes {dimension_semantics = [#tpu.dimension_semantics<parallel>], iteration_bounds = array<i64: 1>, scalar_prefetch = 0 : i64, scratch_operands = 0 : i64, tpu.core_type = #tpu.core_type<tc>, window_params = [{transform_indices = @transform_0, window_bounds = array<i64: 16, 32>}, {pipeline_mode = #tpu.pipeline_mode<synchronous>, transform_indices = @transform_1, window_bounds = array<i64: 32, 64>}, {pipeline_mode = #tpu.pipeline_mode<synchronous>, transform_indices = @transform_2, window_bounds = array<i64: 1, 64>}, {transform_indices = @transform_3, window_bounds = array<i64: 16, 64>}]} {
    %c0 = arith.constant 0 : index
    %c0_0 = arith.constant 0 : index
    %0 = vector.load %arg1[%c0, %c0_0] : memref<16x32xf32, #tpu.memory_space<vmem>>, vector<16x32xf32>
    %c0_1 = arith.constant 0 : index
    %c0_2 = arith.constant 0 : index
    %1 = vector.load %arg2[%c0_1, %c0_2] : memref<32x64xf32, #tpu.memory_space<vmem>>, vector<32x64xf32>
    %cst = arith.constant dense<0.000000e+00> : vector<16x64xf32>
    %2 = tpu.matmul %0, %1, %cst {dimension_numbers = #tpu.dot_dimension_numbers<[1], [0], [0], [1], [0, 0, 1, 1], [], []>} : vector<16x32xf32>, vector<32x64xf32>, vector<16x64xf32> -> vector<16x64xf32>
    %c0_3 = arith.constant 0 : index
    %c0_4 = arith.constant 0 : index
    %3 = vector.load %arg3[%c0_3, %c0_4] : memref<1x64xf32, #tpu.memory_space<vmem>>, vector<1x64xf32>
    %4 = vector.broadcast %3 : vector<1x64xf32> to vector<16x64xf32>
    %5 = arith.addf %2, %4 : vector<16x64xf32>
    %cst_5 = arith.constant 5.000000e-01 : f32
    %6 = vector.broadcast %cst_5 : f32 to vector<16x64xf32>
    %7 = arith.mulf %6, %5 : vector<16x64xf32>
    %cst_6 = arith.constant 0.707106769 : f32
    %8 = vector.broadcast %cst_6 : f32 to vector<16x64xf32>
    %9 = arith.mulf %5, %8 : vector<16x64xf32>
    %10 = math.erf %9 : vector<16x64xf32>
    %cst_7 = arith.constant 1.000000e+00 : f32
    %11 = vector.broadcast %cst_7 : f32 to vector<16x64xf32>
    %12 = arith.addf %11, %10 : vector<16x64xf32>
    %13 = arith.mulf %7, %12 : vector<16x64xf32>
    %c0_8 = arith.constant 0 : index
    %c0_9 = arith.constant 0 : index
    %14 = vector.load %arg4[%c0_8, %c0_9] : memref<16x64xf32, #tpu.memory_space<vmem>>, vector<16x64xf32>
    tpu.vector_store %arg4[%c0_8, %c0_9], %13 {strides = array<i32>} : memref<16x64xf32, #tpu.memory_space<vmem>>, vector<16x64xf32>,
    return
  }
  func.func @transform_0(%arg0: i32) -> (i32, i32) {
    %c0_i32 = arith.constant 0 : i32
    %c0_i32_0 = arith.constant 0 : i32
    return %arg0, %c0_i32 : i32, i32
  }
  func.func @transform_1(%arg0: i32) -> (i32, i32) {
    %c0_i32 = arith.constant 0 : i32
    %c0_i32_0 = arith.constant 0 : i32
    %c0_i32_1 = arith.constant 0 : i32
    return %c0_i32, %c0_i32_0 : i32, i32
  }
  func.func @transform_2(%arg0: i32) -> (i32, i32) {
    %c0_i32 = arith.constant 0 : i32
    %c0_i32_0 = arith.constant 0 : i32
    %c0_i32_1 = arith.constant 0 : i32
    return %c0_i32, %c0_i32_0 : i32, i32
  }
  func.func @transform_3(%arg0: i32) -> (i32, i32) {
    %c0_i32 = arith.constant 0 : i32
    %c0_i32_0 = arith.constant 0 : i32
    return %arg0, %c0_i32 : i32, i32
  }
}

</mosaic_0001>

<bundles_post_ra>
// kernel: tpu_custom_call.1
= control target key start
LH: loop header
LB: loop body
LE: loop exit
PB: predicated region body
PF: predicated region fallthrough
CT: control target
= control target key end

     0   :  { %8 = vsyncpa [#allocation3], 0  ;;  %s351_s0 = inlined_call_operand.hbm [shape: f32[16,32], index: 0, kind: input, shape index: {}]   ;;  %s352_s1 = inlined_call_operand.hbm [shape: f32[32,64], index: 1, kind: input, shape index: {}]   ;;  %s353_s2 = inlined_call_operand.vmem [shape: f32[1,64], index: 2, kind: input, shape index: {}]   ;;  %s354_s3 = inlined_call_operand.hbm [shape: f32[16,64], index: 3, kind: output, shape index: {}]  }
   0x1   :  { %9 = vsyncpa [#allocation6], 0 }
   0x2   :  { %10 = vsyncpa [#allocation4], 0  ;;  %s278_s12 = smov [#allocation2]   ;;  %s206_s16 = scalar_lea.hbm %s351_s0, 256 }
   0x3   :  { %s16_s13 = sshll.u32 %s278_s12, 4  ;;  %p207_p0 = scmp.ne.s32.totalorder %s351_s0, %s206_s16  ;;  %s17_s13 = int_to_ptr.vmem [resolvable:$true] %s16_s13 }
   0x4   :  { %p210_p1 = scmp.lt.u32.totalorder %s206_s16, %s351_s0 }
   0x6   :  { %p212_p2 = pnand %p210_p1, %p207_p0 }
   0x8   :  { %215 = shalt.err (!%p212_p2)
}
   0x9   :  { %s216_s21 = scalar_lea.vmem %s17_s13, 256  ;;  %p221_p4 = scmp.lt.s32.totalorder %s17_s13, %s17_s13 }
   0xa   :  { %p217_p3 = scmp.ne.s32.totalorder %s17_s13, %s216_s21  ;;  %p222_p5 = scmp.lt.s32.totalorder %s216_s21, %s216_s21 }
   0xc   :  { %p223_p6 = por %p222_p5, %p221_p4 }
   0xe   :  { %p224_p7 = pnand %p223_p6, %p217_p3 }
  0x10   :  { %227 = shalt.err (!%p224_p7)
}
  0x11   :  { %s279_s22 = smov 128   ;;  %s280_s23 = smov 8  }
  0x12   :  { %22 = dma.hbm_to_vmem [thread:$0]  %s351_s0, 256, %s17_s13, [#allocation3], %s279_s22, %s279_s22, %s280_s23  }
  0x13   :  { %s281_s26 = smov [#allocation5]   ;;  %s228_s30 = scalar_lea.hbm %s352_s1, 512 }
  0x14   :  { %s28_s27 = sshll.u32 %s281_s26, 4  ;;  %p229_p8 = scmp.ne.s32.totalorder %s352_s1, %s228_s30  ;;  %s29_s27 = int_to_ptr.vmem [resolvable:$true] %s28_s27 }
  0x15   :  { %p232_p9 = scmp.lt.u32.totalorder %s228_s30, %s352_s1 }
  0x17   :  { %p234_p10 = pnand %p232_p9, %p229_p8 }
  0x19   :  { %237 = shalt.err (!%p234_p10)
}
  0x1a   :  { %s238_s8 = scalar_lea.vmem %s29_s27, 512  ;;  %p243_p12 = scmp.lt.s32.totalorder %s29_s27, %s29_s27 }
  0x1b   :  { %p239_p11 = scmp.ne.s32.totalorder %s29_s27, %s238_s8  ;;  %p244_p13 = scmp.lt.s32.totalorder %s238_s8, %s238_s8 }
  0x1d   :  { %p245_p0 = por %p244_p13, %p243_p12 }
  0x1f   :  { %p246_p1 = pnand %p245_p0, %p239_p11 }
  0x21   :  { %249 = shalt.err (!%p246_p1)
}
  0x22   :  { %34 = dma.hbm_to_vmem [thread:$0]  %s352_s1, 512, %s29_s27, [#allocation6], %s279_s22, %s279_s22, %s280_s23  }
  0x23   :  { %272 = dma.done.wait [#allocation3], 256  }
  0x24   :  { %273 = vsyncadd [#allocation3], 4294967040 }
  0x25   :  { %274 = dma.done.wait [#allocation6], 512  }
  0x26   :  { %275 = vsyncadd [#allocation6], 4294966784  ;;  %vm56_vm0 = vcmask 261120   ;;  %v45_v0 = vld [vmem:[#allocation5] sm:$0xff]  ;;  %v46_v1 = vld [vmem:[#allocation5 + $0x8] sm:$0xff]  ;;  %s282_s11 = smov [#allocation7]  }
  0x27   :  { %v47_v2 = vld [vmem:[#allocation5 + $0x10] sm:$0xff]  ;;  %v189_v3 = vpack.c.bf16 %v46_v1, %v45_v0  ;;  %v48_v4 = vld [vmem:[#allocation5 + $0x18] sm:$0xff]  ;;  %s156_s12 = sshll.u32 %s282_s11, 4  ;;  %vm148_vm1 = vcmask 523264   ;;  %s157_s12 = int_to_ptr.vmem [resolvable:$true] %s156_s12 }
  0x28   :  { %v43_v5 = vld [vmem:[#allocation2] sm:$0xff]  ;;  %v193_v6 = vpack.c.bf16 %v48_v4, %v47_v2  ;;  %v44_v7 = vld [vmem:[#allocation2 + $0x8] sm:$0xff]  ;;  %p255_p3 = scmp.lt.s32.totalorder %s157_s12, %s157_s12 }
  0x29   :  { %186 = vmatprep.mubr.msk.f32.mxu0 %vm56_vm0, %v43_v5  ;;  %190 = vmatprep.subr.bf16.mxu0 %v189_v3  ;;  %v169_v8 = vld [vmem:[%s353_s2] ss:$0 sm:$0xff]  ;;  %s250_s2 = scalar_lea.vmem %s157_s12, 256 }
  0x2a   :  { %192 = vmatpush3.bf16.msra.mxu0 %v189_v3  ;;  %p251_p2 = scmp.ne.s32.totalorder %s157_s12, %s250_s2  ;;  %p256_p4 = scmp.lt.s32.totalorder %s250_s2, %s250_s2 }
  0x2b   :  { %194 = vmatprep.subr.bf16.mxu0 %v193_v6 }
  0x2c   :  { %p257_p5 = por %p256_p4, %p255_p3 }
  0x2e   :  { %196 = vmatpush3.bf16.msra.mxu0 %v193_v6  ;;  %p258_p6 = pnand %p257_p5, %p251_p2 }
  0x31   :  { %187 = vmatmul.mubr.msk.f32.vlgmr.msra.gmra.mrb[0].mxu0 %vm56_vm0, %v44_v7 }
 0x104   :  { %v188_v9 = vpop.f32.mrb[0].mxu0 }
 0x105   :  { %v135_v10 = vadd.f32 %v188_v9, %v169_v8  ;;  %v129_v11 = vpop.f32.mrb[1].mxu0 }
 0x106   :  { %v130_v12 = vadd.f32 %v169_v8, %v129_v11 }
 0x107   :  { %v141_v13 = vmul.f32 0.70710677, %v135_v10  ;;  %v139_v17 = vmul.f32 0.5, %v135_v10 }
 0x108   :  { %v140_v14 = vmul.f32 0.70710677, %v130_v12  ;;  %v138_v19 = vmul.f32 0.5, %v130_v12 }
 0x109   :  { %202 = verf.f32 %v141_v13 }
 0x10a   :  { %204 = verf.f32 %v140_v14 }
 0x113   :  { %v203_v15 = vpop.eup %202 }
 0x114   :  { %v205_v16 = vpop.eup %204  ;;  %v145_v18 = vadd.f32 1.0, %v203_v15 }
 0x115   :  { %v144_v20 = vadd.f32 1.0, %v205_v16 }
 0x116   :  { %v147_v21 = vmul.f32 %v145_v18, %v139_v17 }
 0x117   :  { %v146_v22 = vmul.f32 %v144_v20, %v138_v19 }
 0x118   :  { %150 = vst.msk [vmem:[#allocation7 + $0x8] sm:$0xff] %vm148_vm1, %v147_v21 }
 0x119   :  { %149 = vst.msk [vmem:[#allocation7] sm:$0xff] %vm148_vm1, %v146_v22 }
 0x11a   :  { %261 = shalt.err (!%p258_p6)
}
 0x11b   :  { %s262_s15 = scalar_lea.hbm %s354_s3, 256 }
 0x11c   :  { %p263_p7 = scmp.ne.s32.totalorder %s354_s3, %s262_s15  ;;  %p266_p8 = scmp.lt.u32.totalorder %s262_s15, %s354_s3 }
 0x11e   :  { %p268_p9 = pnand %p266_p8, %p263_p7 }
 0x120   :  { %271 = shalt.err (!%p268_p9)
}
 0x121   :  { %162 = dma.vmem_to_hbm [thread:$0]  %s157_s12, 256, %s354_s3, [#allocation4], %s279_s22, %s279_s22, %s280_s23  }
 0x122   :  { %276 = dma.done.wait [#allocation4], 256  }
 0x123   :  { %277 = vsyncadd [#allocation4], 4294967040 }
 0x124   :  { %166 = vsyncpa [#allocation3], 1 }
 0x125   :  { %167 = vsyncpa [#allocation6], 1 }
 0x126   :  { %168 = vsyncpa [#allocation4], 1 }

</bundles_post_ra>
